<compile_context>
chip_gen: v6e
topology: v6e:2x2x1
jax: 0.10.0
libtpu: 0.0.40
codegen_flags: <defaults>
</compile_context>

<pallas_src>
import functools
import math

import jax
import jax.numpy as jnp
from jax.experimental import pallas as pl
from jax.experimental.pallas import tpu as pltpu


# ----------------------------------------------------------------------------
# Pallas kernel: depthwise KxK conv + stride + bias, fused, lane-dense.
# ----------------------------------------------------------------------------
def _dw_conv_kernel(x_ref, w_ref, b_ref, o_ref, *, K, stride, pad, OH, C, L):
    """One batch element per grid step.

    x_ref : (1, s, Hp, L)   H-zero-padded parity planes; lane = plane_col*C + c
    w_ref : (K*K, L)        per-tap weights, tiled along lanes and pre-masked
                            for the horizontal 'same' boundary (zeros there)
    b_ref : (1, L)          bias tiled along lanes
    o_ref : (1, OH, L)      lane-dense output block (wrapper slices to OW*C)
    """
    s = stride
    # Load all taps once (hoisted); index the value inside the loop.
    w_taps = w_ref[...]                                       # (K*K, L)

    # Accumulator initialized from the bias -> saves a final full-tile add.
    acc = jnp.broadcast_to(b_ref[...], (OH, L)).astype(jnp.float32)

    for i in range(K):
        # Vertical tap: rows oh*s + i of the H-padded planes.
        row_sl = pl.ds(i, OH) if s == 1 else pl.ds(i, OH, stride=s)
        rows = x_ref[:, :, row_sl, :]                          # (1, s, OH, L)
        for j in range(K):
            d = j - pad
            p, q = d % s, d // s          # parity plane / column shift (static)
            win = rows[0, p]                                   # (OH, L)
            shift = (-q * C) % L
            if shift:
                # Horizontal tap as an XLU lane-roll (doesn't compete with the
                # VALU multiply-accumulate).  Wrap-around garbage lands only on
                # lanes whose weight was pre-masked to zero.
                win = pltpu.roll(win, shift=shift, axis=1)
            acc = acc + win * w_taps[i * K + j]                # lane broadcast

    o_ref[...] = acc[None]


# ----------------------------------------------------------------------------
# Jitted forward wrapper (NCHW in / NCHW out).  All static params baked in.
# ----------------------------------------------------------------------------
def _dw_forward(x_nchw, w_taps, b_tile, *, K, stride, pad, Wp):
    N, C, H, W = x_nchw.shape
    s = stride
    OH = (H + 2 * pad - K) // s + 1
    OW = (W + 2 * pad - K) // s + 1
    L = Wp * C
    Hp = H + 2 * pad

    # ---- boundary layout glue (fuses into a couple of tiny XLA ops) --------
    x = jnp.transpose(x_nchw, (0, 2, 3, 1)).astype(jnp.float32)     # (N,H,W,C)
    planes = []
    for p in range(s):                       # W-parity split (identity if s==1)
        xp = x[:, :, p::s, :]                                       # (N,H,Wv,C)
        if xp.shape[2] < Wp:                 # pad plane width to 128-lane mult.
            xp = jnp.pad(xp, ((0, 0), (0, 0), (0, Wp - xp.shape[2]), (0, 0)))
        planes.append(xp.reshape(N, H, L))
    xs = jnp.stack(planes, axis=1)                                  # (N,s,H,L)
    if pad:
        xs = jnp.pad(xs, ((0, 0), (0, 0), (pad, pad), (0, 0)))      # 'same' in H

    kern = functools.partial(_dw_conv_kernel, K=K, stride=s, pad=pad,
                             OH=OH, C=C, L=L)
    y = pl.pallas_call(
        kern,
        out_shape=jax.ShapeDtypeStruct((N, OH, L), jnp.float32),
        grid=(N,),                                    # batch on the grid
        in_specs=[
            pl.BlockSpec((1, s, Hp, L), lambda n: (n, 0, 0, 0)),
            pl.BlockSpec((K * K, L), lambda n: (0, 0)),
            pl.BlockSpec((1, L), lambda n: (0, 0)),
        ],
        out_specs=pl.BlockSpec((1, OH, L), lambda n: (n, 0, 0)),
        compiler_params=pltpu.CompilerParams(
            dimension_semantics=("parallel",)),       # megacore split on v7x
    )(xs, w_taps, b_tile)

    # Slice off the lane padding and go back to NCHW (fuses with the output
    # relayout that exists anyway).
    y = y[:, :, :OW * C].reshape(N, OH, OW, C)
    return jnp.transpose(y, (0, 3, 1, 2))


# ----------------------------------------------------------------------------
# One-time (per input shape) parameter expansion: tiled + masked tap weights.
# ----------------------------------------------------------------------------
def _expand_params(weight, bias, *, K, stride, pad, W, Wp):
    C = weight.shape[0]
    s = stride
    ow = jnp.arange(Wp)                                        # output column
    wcol = ow[None, :] * s + (jnp.arange(K)[:, None] - pad)    # (K, Wp) src col
    mask = ((wcol >= 0) & (wcol < W)).astype(jnp.float32)      # 'same' in W
    w_ijc = jnp.transpose(weight.reshape(C, K, K).astype(jnp.float32),
                          (1, 2, 0))                           # (K, K, C)
    w_taps = (w_ijc[:, :, None, :] * mask[None, :, :, None]
              ).reshape(K * K, Wp * C)                         # (K*K, L)
    b_tile = jnp.tile(bias.astype(jnp.float32), (Wp,)).reshape(1, Wp * C)
    return w_taps, b_tile


class DepthWiseConvolution:
    """JAX/Pallas equivalent of the PyTorch DepthWiseConvolution module."""

    def __init__(self, channels, kernelSize, stride, expansionFactor, key):
        channels = channels * expansionFactor
        self.channels = channels
        self.kernel_size = kernelSize
        self.stride = stride
        self.pad = (kernelSize - 1) // 2
        k1, k2 = jax.random.split(key)
        fan_in = kernelSize * kernelSize       # groups=C -> 1 in-chan per group
        bound = 1.0 / math.sqrt(fan_in)
        self.weight = jax.random.uniform(
            k1, (channels, 1, kernelSize, kernelSize), jnp.float32, -bound, bound)
        self.bias = jax.random.uniform(k2, (channels,), jnp.float32, -bound, bound)
        self._cache = {}    # (H, W) -> (w_taps, b_tile, jitted fwd)

    def _get(self, H, W):
        key = (H, W)
        if key not in self._cache:
            s, K, pad, C = self.stride, self.kernel_size, self.pad, self.channels
            w_cols = -(-W // s)                        # ceil(W / s)
            m = 128 // math.gcd(C, 128)                # columns per 128 lanes
            Wp = -(-w_cols // m) * m                   # lane dim = multiple of 128
            w_taps, b_tile = _expand_params(self.weight, self.bias, K=K,
                                            stride=s, pad=pad, W=W, Wp=Wp)
            fwd = jax.jit(functools.partial(_dw_forward, K=K, stride=s,
                                            pad=pad, Wp=Wp))
            self._cache[key] = (w_taps, b_tile, fwd)
        return self._cache[key]

    def __call__(self, x):
        _, _, H, W = x.shape
        w_taps, b_tile, fwd = self._get(H, W)
        return fwd(x, w_taps, b_tile)


# ----------------------------------------------------------------------------
# Pure-JAX reference (identical semantics to torch.nn.Conv2d, groups=C).
# ----------------------------------------------------------------------------
def _reference(x, weight, bias, stride, pad):
    y = jax.lax.conv_general_dilated(
        x, weight, window_strides=(stride, stride),
        padding=[(pad, pad), (pad, pad)],
        dimension_numbers=("NCHW", "OIHW", "NCHW"),
        feature_group_count=x.shape[1])
    return y + bias.reshape(1, -1, 1, 1)


if __name__ == "__main__":
    key = jax.random.PRNGKey(0)
    kx1, kx2, km1, km2 = jax.random.split(key, 4)

    # Config 1: channels=4, expansionFactor=1, kernel=3, stride=1
    m1 = DepthWiseConvolution(4, 3, 1, 1, km1)
    x1 = jax.random.normal(kx1, (2, 4, 16, 16), jnp.float32)     # NCHW
    y1 = jax.block_until_ready(m1(x1))
    r1 = _reference(x1, m1.weight, m1.bias, stride=1, pad=1)
    assert y1.shape == (2, 4, 16, 16), y1.shape
    assert bool(jnp.all(jnp.isfinite(y1)))
    assert bool(jnp.allclose(y1, r1, atol=1e-4, rtol=1e-4)), \
        float(jnp.max(jnp.abs(y1 - r1)))

    # Config 2: channels=4, expansionFactor=2, kernel=5, stride=2
    m2 = DepthWiseConvolution(4, 5, 2, 2, km2)
    x2 = jax.random.normal(kx2, (2, 8, 16, 16), jnp.float32)     # NCHW
    y2 = jax.block_until_ready(m2(x2))
    r2 = _reference(x2, m2.weight, m2.bias, stride=2, pad=2)
    assert y2.shape == (2, 8, 8, 8), y2.shape
    assert bool(jnp.all(jnp.isfinite(y2)))
    assert bool(jnp.allclose(y2, r2, atol=1e-4, rtol=1e-4)), \
        float(jnp.max(jnp.abs(y2 - r2)))

    print("KERNEL_OK")
</pallas_src>

<mosaic_0001>
module attributes {stable_mosaic.version = 11 : i64} {
  func.func @_dw_conv_kernel(%arg0: i32, %arg1: memref<1x1x18x128xf32, #tpu.memory_space<vmem>>, %arg2: memref<9x128xf32, #tpu.memory_space<vmem>>, %arg3: memref<1x128xf32, #tpu.memory_space<vmem>>, %arg4: memref<1x16x128xf32, #tpu.memory_space<vmem>>) attributes {dimension_semantics = [#tpu.dimension_semantics<parallel>], iteration_bounds = array<i64: 2>, scalar_prefetch = 0 : i64, scratch_operands = 0 : i64, tpu.core_type = #tpu.core_type<tc>, window_params = [{transform_indices = @transform_0, window_bounds = array<i64: 1, 1, 18, 128>}, {pipeline_mode = #tpu.pipeline_mode<synchronous>, transform_indices = @transform_1, window_bounds = array<i64: 9, 128>}, {pipeline_mode = #tpu.pipeline_mode<synchronous>, transform_indices = @transform_2, window_bounds = array<i64: 1, 128>}, {transform_indices = @transform_3, window_bounds = array<i64: 1, 16, 128>}]} {
    %c0 = arith.constant 0 : index
    %c0_0 = arith.constant 0 : index
    %0 = vector.load %arg2[%c0, %c0_0] : memref<9x128xf32, #tpu.memory_space<vmem>>, vector<9x128xf32>
    %c0_1 = arith.constant 0 : index
    %c0_2 = arith.constant 0 : index
    %1 = vector.load %arg3[%c0_1, %c0_2] : memref<1x128xf32, #tpu.memory_space<vmem>>, vector<1x128xf32>
    %2 = vector.shape_cast %1 : vector<1x128xf32> to vector<1x128xf32>
    %3 = vector.broadcast %2 : vector<1x128xf32> to vector<16x128xf32>
    %c0_3 = arith.constant 0 : index
    %c0_4 = arith.constant 0 : index
    %c0_5 = arith.constant 0 : index
    %c0_6 = arith.constant 0 : index
    %4 = vector.load %arg1[%c0_3, %c0_4, %c0_5, %c0_6] : memref<1x1x18x128xf32, #tpu.memory_space<vmem>>, vector<1x1x16x128xf32>
    %5 = vector.shape_cast %4 : vector<1x1x16x128xf32> to vector<16x128xf32>
    %c4_i32 = arith.constant 4 : i32
    %6 = tpu.dynamic_rotate %5 by %c4_i32 dim 1 : vector<16x128xf32>, i32 -> vector<16x128xf32>
    %7 = vector.extract_strided_slice %0 {offsets = [0, 0], sizes = [1, 128], strides = [1, 1]} : vector<9x128xf32> to vector<1x128xf32>
    %8 = vector.shape_cast %7 : vector<1x128xf32> to vector<128xf32>
    %9 = vector.shape_cast %8 : vector<128xf32> to vector<1x128xf32>
    %10 = vector.broadcast %9 : vector<1x128xf32> to vector<16x128xf32>
    %11 = arith.mulf %6, %10 : vector<16x128xf32>
    %12 = arith.addf %3, %11 : vector<16x128xf32>
    %13 = vector.shape_cast %4 : vector<1x1x16x128xf32> to vector<16x128xf32>
    %14 = vector.extract_strided_slice %0 {offsets = [1, 0], sizes = [1, 128], strides = [1, 1]} : vector<9x128xf32> to vector<1x128xf32>
    %15 = vector.shape_cast %14 : vector<1x128xf32> to vector<128xf32>
    %16 = vector.shape_cast %15 : vector<128xf32> to vector<1x128xf32>
    %17 = vector.broadcast %16 : vector<1x128xf32> to vector<16x128xf32>
    %18 = arith.mulf %13, %17 : vector<16x128xf32>
    %19 = arith.addf %12, %18 : vector<16x128xf32>
    %20 = vector.shape_cast %4 : vector<1x1x16x128xf32> to vector<16x128xf32>
    %c124_i32 = arith.constant 124 : i32
    %21 = tpu.dynamic_rotate %20 by %c124_i32 dim 1 : vector<16x128xf32>, i32 -> vector<16x128xf32>
    %22 = vector.extract_strided_slice %0 {offsets = [2, 0], sizes = [1, 128], strides = [1, 1]} : vector<9x128xf32> to vector<1x128xf32>
    %23 = vector.shape_cast %22 : vector<1x128xf32> to vector<128xf32>
    %24 = vector.shape_cast %23 : vector<128xf32> to vector<1x128xf32>
    %25 = vector.broadcast %24 : vector<1x128xf32> to vector<16x128xf32>
    %26 = arith.mulf %21, %25 : vector<16x128xf32>
    %27 = arith.addf %19, %26 : vector<16x128xf32>
    %c0_7 = arith.constant 0 : index
    %c0_8 = arith.constant 0 : index
    %c1 = arith.constant 1 : index
    %c0_9 = arith.constant 0 : index
    %28 = vector.load %arg1[%c0_7, %c0_8, %c1, %c0_9] : memref<1x1x18x128xf32, #tpu.memory_space<vmem>>, vector<1x1x16x128xf32>
    %29 = vector.shape_cast %28 : vector<1x1x16x128xf32> to vector<16x128xf32>
    %c4_i32_10 = arith.constant 4 : i32
    %30 = tpu.dynamic_rotate %29 by %c4_i32_10 dim 1 : vector<16x128xf32>, i32 -> vector<16x128xf32>
    %31 = vector.extract_strided_slice %0 {offsets = [3, 0], sizes = [1, 128], strides = [1, 1]} : vector<9x128xf32> to vector<1x128xf32>
    %32 = vector.shape_cast %31 : vector<1x128xf32> to vector<128xf32>
    %33 = vector.shape_cast %32 : vector<128xf32> to vector<1x128xf32>
    %34 = vector.broadcast %33 : vector<1x128xf32> to vector<16x128xf32>
    %35 = arith.mulf %30, %34 : vector<16x128xf32>
    %36 = arith.addf %27, %35 : vector<16x128xf32>
    %37 = vector.shape_cast %28 : vector<1x1x16x128xf32> to vector<16x128xf32>
    %38 = vector.extract_strided_slice %0 {offsets = [4, 0], sizes = [1, 128], strides = [1, 1]} : vector<9x128xf32> to vector<1x128xf32>
    %39 = vector.shape_cast %38 : vector<1x128xf32> to vector<128xf32>
    %40 = vector.shape_cast %39 : vector<128xf32> to vector<1x128xf32>
    %41 = vector.broadcast %40 : vector<1x128xf32> to vector<16x128xf32>
    %42 = arith.mulf %37, %41 : vector<16x128xf32>
    %43 = arith.addf %36, %42 : vector<16x128xf32>
    %44 = vector.shape_cast %28 : vector<1x1x16x128xf32> to vector<16x128xf32>
    %c124_i32_11 = arith.constant 124 : i32
    %45 = tpu.dynamic_rotate %44 by %c124_i32_11 dim 1 : vector<16x128xf32>, i32 -> vector<16x128xf32>
    %46 = vector.extract_strided_slice %0 {offsets = [5, 0], sizes = [1, 128], strides = [1, 1]} : vector<9x128xf32> to vector<1x128xf32>
    %47 = vector.shape_cast %46 : vector<1x128xf32> to vector<128xf32>
    %48 = vector.shape_cast %47 : vector<128xf32> to vector<1x128xf32>
    %49 = vector.broadcast %48 : vector<1x128xf32> to vector<16x128xf32>
    %50 = arith.mulf %45, %49 : vector<16x128xf32>
    %51 = arith.addf %43, %50 : vector<16x128xf32>
    %c0_12 = arith.constant 0 : index
    %c0_13 = arith.constant 0 : index
    %c2 = arith.constant 2 : index
    %c0_14 = arith.constant 0 : index
    %52 = vector.load %arg1[%c0_12, %c0_13, %c2, %c0_14] : memref<1x1x18x128xf32, #tpu.memory_space<vmem>>, vector<1x1x16x128xf32>
    %53 = vector.shape_cast %52 : vector<1x1x16x128xf32> to vector<16x128xf32>
    %c4_i32_15 = arith.constant 4 : i32
    %54 = tpu.dynamic_rotate %53 by %c4_i32_15 dim 1 : vector<16x128xf32>, i32 -> vector<16x128xf32>
    %55 = vector.extract_strided_slice %0 {offsets = [6, 0], sizes = [1, 128], strides = [1, 1]} : vector<9x128xf32> to vector<1x128xf32>
    %56 = vector.shape_cast %55 : vector<1x128xf32> to vector<128xf32>
    %57 = vector.shape_cast %56 : vector<128xf32> to vector<1x128xf32>
    %58 = vector.broadcast %57 : vector<1x128xf32> to vector<16x128xf32>
    %59 = arith.mulf %54, %58 : vector<16x128xf32>
    %60 = arith.addf %51, %59 : vector<16x128xf32>
    %61 = vector.shape_cast %52 : vector<1x1x16x128xf32> to vector<16x128xf32>
    %62 = vector.extract_strided_slice %0 {offsets = [7, 0], sizes = [1, 128], strides = [1, 1]} : vector<9x128xf32> to vector<1x128xf32>
    %63 = vector.shape_cast %62 : vector<1x128xf32> to vector<128xf32>
    %64 = vector.shape_cast %63 : vector<128xf32> to vector<1x128xf32>
    %65 = vector.broadcast %64 : vector<1x128xf32> to vector<16x128xf32>
    %66 = arith.mulf %61, %65 : vector<16x128xf32>
    %67 = arith.addf %60, %66 : vector<16x128xf32>
    %68 = vector.shape_cast %52 : vector<1x1x16x128xf32> to vector<16x128xf32>
    %c124_i32_16 = arith.constant 124 : i32
    %69 = tpu.dynamic_rotate %68 by %c124_i32_16 dim 1 : vector<16x128xf32>, i32 -> vector<16x128xf32>
    %70 = vector.extract_strided_slice %0 {offsets = [8, 0], sizes = [1, 128], strides = [1, 1]} : vector<9x128xf32> to vector<1x128xf32>
    %71 = vector.shape_cast %70 : vector<1x128xf32> to vector<128xf32>
    %72 = vector.shape_cast %71 : vector<128xf32> to vector<1x128xf32>
    %73 = vector.broadcast %72 : vector<1x128xf32> to vector<16x128xf32>
    %74 = arith.mulf %69, %73 : vector<16x128xf32>
    %75 = arith.addf %67, %74 : vector<16x128xf32>
    %76 = vector.shape_cast %75 : vector<16x128xf32> to vector<1x16x128xf32>
    %c0_17 = arith.constant 0 : index
    %c0_18 = arith.constant 0 : index
    %c0_19 = arith.constant 0 : index
    %77 = vector.load %arg4[%c0_17, %c0_18, %c0_19] : memref<1x16x128xf32, #tpu.memory_space<vmem>>, vector<1x16x128xf32>
    tpu.vector_store %arg4[%c0_17, %c0_18, %c0_19], %76 {strides = array<i32>} : memref<1x16x128xf32, #tpu.memory_space<vmem>>, vector<1x16x128xf32>,
    return
  }
  func.func @transform_0(%arg0: i32) -> (i32, i32, i32, i32) {
    %c0_i32 = arith.constant 0 : i32
    %c0_i32_0 = arith.constant 0 : i32
    %c0_i32_1 = arith.constant 0 : i32
    %c0_i32_2 = arith.constant 0 : i32
    return %arg0, %c0_i32, %c0_i32_0, %c0_i32_1 : i32, i32, i32, i32
  }
  func.func @transform_1(%arg0: i32) -> (i32, i32) {
    %c0_i32 = arith.constant 0 : i32
    %c0_i32_0 = arith.constant 0 : i32
    %c0_i32_1 = arith.constant 0 : i32
    return %c0_i32, %c0_i32_0 : i32, i32
  }
  func.func @transform_2(%arg0: i32) -> (i32, i32) {
    %c0_i32 = arith.constant 0 : i32
    %c0_i32_0 = arith.constant 0 : i32
    %c0_i32_1 = arith.constant 0 : i32
    return %c0_i32, %c0_i32_0 : i32, i32
  }
  func.func @transform_3(%arg0: i32) -> (i32, i32, i32) {
    %c0_i32 = arith.constant 0 : i32
    %c0_i32_0 = arith.constant 0 : i32
    %c0_i32_1 = arith.constant 0 : i32
    return %arg0, %c0_i32, %c0_i32_0 : i32, i32, i32
  }
}

</mosaic_0001>

<bundles_post_ra>
// kernel: _dw_forward.1
= control target key start
LH: loop header
LB: loop body
LE: loop exit
PB: predicated region body
PF: predicated region fallthrough
CT: control target
= control target key end

     0   :  { %s393_s12 = smov 0   ;;  %s423_s0 = inlined_call_operand.vmem [shape: f32[2,1,18,128], index: 0, kind: input, shape index: {}]   ;;  %s424_s1 = inlined_call_operand.vmem [shape: f32[9,128], index: 1, kind: input, shape index: {}]   ;;  %s425_s2 = inlined_call_operand.vmem [shape: f32[1,128], index: 2, kind: input, shape index: {}]   ;;  %s426_s3 = inlined_call_operand.vmem [shape: f32[2,16,128], index: 3, kind: output, shape index: {}]  }
   0x1 LB: > { %s339_s13 = sadd.s32 4294967295, %s369_s12   ;;  %p343_p0 = scmp.ge.s32.totalorder %s369_s12, 1  ;;  %s369_s12 = sphi %s393_s12, %s13_s12  }
   0x2   : > { %p137_p1 = scmp.lt.s32.totalorder %s369_s12, 3 }
   0x4   : > { %p138_p2 = pnand %p343_p0, %p137_p1 }
   0x5   : > { %p161_p3 = scmp.lt.s32.totalorder (!%p138_p2), %s339_s13, 1  ;;  %s371_s18 = smov (!%p138_p2), 124  }
   0x6   : > { %141 = sbr.rel (%p138_p2) target bundleno = 156 (0x9c), region = 32  ;;  %s372_s19 = smov (!%p138_p2), 4  }
   0xb   : > { %s428_s13 = smov (!%p161_p3, %s339_s13), 1  ;;  %v186_v6 = vlaneseq  ;;  %v171_v10 = vld [vmem:[%s424_s1] sm:$0xff] }
   0xc   : > { %s352_s14 = smul.u32 24, %s428_s13  ;;  %v347_v16 = vld [vmem:[%s425_s2] ss:$0 sm:$0xff]  ;;  %s351_s26 = sshll.u32 %s428_s13, 4 }
   0xd   : > { %v187_v7 = vshrl.u32 %v186_v6, 7  ;;  %s170_s29 = scalar_lea.vmem %s426_s3, %s351_s26 }
   0xe   : > { %s165_s17 = scalar_lea.vmem %s423_s0, %s352_s14 }
   0xf   : > { %v180_v0 = vld [vmem:[%s165_s17] sm:$0xff]  ;;  %v181_v1 = vld [vmem:[%s165_s17 + $0x8] sm:$0xff]  ;;  %v196_v8 = vsub.s32 1, %v187_v7  ;;  %v188_v9 = vsub.s32 0, %v187_v7  ;;  %v208_v13 = vsub.s32 2, %v187_v7  ;;  %v230_v14 = vsub.s32 4, %v187_v7 }
  0x10   : > { %202 = vrot.lane.b32.xlu1 %v180_v0, %s371_s18  ;;  %182 = vrot.lane.b32.xlu0 %v180_v0, %s372_s19  ;;  %v215_v2 = vld [vmem:[%s165_s17 + $0x9] sm:$0xff]  ;;  %v214_v3 = vld [vmem:[%s165_s17 + $0x1] sm:$0xff]  ;;  %v222_v20 = vsub.s32 3, %v187_v7  ;;  %v242_v26 = vsub.s32 5, %v187_v7  ;;  %v264_v34 = vsub.s32 7, %v187_v7  ;;  %v256_v38 = vsub.s32 6, %v187_v7 }
  0x11   : > { %v249_v4 = vld [vmem:[%s165_s17 + $0xa] sm:$0xff]  ;;  %v248_v5 = vld [vmem:[%s165_s17 + $0x2] sm:$0xff]  ;;  %v197_v11 = vrot.slane %v171_v10, %v196_v8  ;;  %v189_v12 = vrot.slane %v171_v10, %v188_v9  ;;  %v209_v21 = vrot.slane %v171_v10, %v208_v13  ;;  %v231_v23 = vrot.slane %v171_v10, %v230_v14 }
  0x12   : > { %v223_v30 = vrot.slane %v171_v10, %v222_v20  ;;  %v243_v37 = vrot.slane %v171_v10, %v242_v26  ;;  %v265_v47 = vrot.slane %v171_v10, %v264_v34  ;;  %v257_v53 = vrot.slane %v171_v10, %v256_v38 }
  0x13   : > { %v198_v18 = vmul.f32 %v197_v11, %v180_v0  ;;  %v199_v27 = vmul.f32 %v197_v11, %v181_v1  ;;  %v232_v33 = vmul.f32 %v231_v23, %v214_v3  ;;  %v233_v43 = vmul.f32 %v231_v23, %v215_v2  ;;  %v348_v0 = vld [vmem:[%s424_s1 + $0x8] ss:$0 sm:$0xff] }
  0x14   : > { %204 = vrot.lane.b32.xlu1 %v181_v1, %s371_s18  ;;  %184 = vrot.lane.b32.xlu0 %v181_v1, %s372_s19  ;;  %v267_v56 = vmul.f32 %v265_v47, %v249_v4  ;;  %v266_v57 = vmul.f32 %v265_v47, %v248_v5 }
  0x18   : > { %218 = vrot.lane.b32.xlu1 %v215_v2, %s372_s19  ;;  %216 = vrot.lane.b32.xlu0 %v214_v3, %s372_s19 }
  0x1c   : > { %238 = vrot.lane.b32.xlu1 %v215_v2, %s371_s18  ;;  %236 = vrot.lane.b32.xlu0 %v214_v3, %s371_s18 }
  0x20   : > { %252 = vrot.lane.b32.xlu1 %v249_v4, %s372_s19  ;;  %250 = vrot.lane.b32.xlu0 %v248_v5, %s372_s19 }
  0x24   : > { %272 = vrot.lane.b32.xlu1 %v249_v4, %s371_s18  ;;  %270 = vrot.lane.b32.xlu0 %v248_v5, %s371_s18 }
  0x82   : > { %v203_v15 = vpop.permute.xlu1 %202  ;;  %v183_v17 = vpop.permute.xlu0 %182 }
  0x83   : > { %v190_v19 = vmul.f32 %v189_v12, %v183_v17  ;;  %v210_v31 = vmul.f32 %v209_v21, %v203_v15 }
  0x85   : > { %v192_v22 = vadd.f32 %v347_v16, %v190_v19 }
  0x86   : > { %v205_v24 = vpop.permute.xlu1 %204  ;;  %v185_v25 = vpop.permute.xlu0 %184 }
  0x87   : > { %v200_v28 = vadd.f32 %v198_v18, %v192_v22  ;;  %v191_v29 = vmul.f32 %v189_v12, %v185_v25  ;;  %v211_v39 = vmul.f32 %v209_v21, %v205_v24 }
  0x89   : > { %v193_v32 = vadd.f32 %v347_v16, %v191_v29  ;;  %v212_v41 = vadd.f32 %v210_v31, %v200_v28 }
  0x8a   : > { %v219_v35 = vpop.permute.xlu1 %218  ;;  %v217_v36 = vpop.permute.xlu0 %216 }
  0x8b   : > { %v201_v40 = vadd.f32 %v199_v27, %v193_v32  ;;  %v224_v42 = vmul.f32 %v223_v30, %v217_v36  ;;  %v225_v45 = vmul.f32 %v223_v30, %v219_v35 }
  0x8d   : > { %v213_v44 = vadd.f32 %v211_v39, %v201_v40  ;;  %v226_v46 = vadd.f32 %v224_v42, %v212_v41 }
  0x8e   : > { %v239_v48 = vpop.permute.xlu1 %238  ;;  %v237_v49 = vpop.permute.xlu0 %236 }
  0x8f   : > { %v227_v50 = vadd.f32 %v225_v45, %v213_v44  ;;  %v234_v51 = vadd.f32 %v232_v33, %v226_v46  ;;  %v244_v52 = vmul.f32 %v243_v37, %v237_v49  ;;  %v245_v55 = vmul.f32 %v243_v37, %v239_v48 }
  0x91   : > { %v235_v54 = vadd.f32 %v233_v43, %v227_v50  ;;  %v246_v61 = vadd.f32 %v244_v52, %v234_v51 }
  0x92   : > { %v253_v58 = vpop.permute.xlu1 %252  ;;  %v251_v59 = vpop.permute.xlu0 %250 }
  0x93   : > { %v247_v60 = vadd.f32 %v245_v55, %v235_v54  ;;  %v259_v62 = vmul.f32 %v257_v53, %v253_v58  ;;  %v258_v63 = vmul.f32 %v257_v53, %v251_v59 }
  0x95   : > { %v261_v1 = vadd.f32 %v259_v62, %v247_v60  ;;  %v260_v2 = vadd.f32 %v258_v63, %v246_v61 }
  0x96   : > { %v273_v3 = vpop.permute.xlu1 %272  ;;  %v271_v6 = vpop.permute.xlu0 %270 }
  0x97   : > { %v269_v7 = vadd.f32 %v267_v56, %v261_v1  ;;  %v279_v8 = vmul.f32 %v348_v0, %v273_v3  ;;  %v268_v9 = vadd.f32 %v266_v57, %v260_v2  ;;  %v278_v4 = vmul.f32 %v348_v0, %v271_v6 }
  0x99   : > { %v281_v5 = vadd.f32 %v279_v8, %v269_v7  ;;  %v280_v10 = vadd.f32 %v278_v4, %v268_v9 }
  0x9b   : > { %283 = vst [vmem:[%s170_s29 + $0x8] sm:$0xff] %v281_v5  ;;  %282 = vst [vmem:[%s170_s29] sm:$0xff] %v280_v10 }
  0x9c PF: > { %s13_s12 = sadd.s32 1, %s369_s12  }
  0x9d   : > { %p10_p4 = scmp.ge.s32.totalorder %s13_s12, 4  }
  0x9f   :  { %12 = sbr.rel (!%p10_p4) target bundleno = 1 (0x1), region = 62 }

</bundles_post_ra>
